<compile_context>
chip_gen: v7x
topology: tpu7x:2x2x1
jax: 0.10.0
libtpu: 0.0.40
codegen_flags: <defaults>
</compile_context>

<pallas_src>
import functools

import jax
import jax.numpy as jnp
from jax.experimental import pallas as pl
from jax.experimental.pallas import tpu as pltpu

DELTA = 0.035
EPS = 0.75
GAMMA = 7


def _make_kernel(eps, delta, gamma):
    """Build the kernel with eps/delta/gamma baked in as compile-time constants."""
    eps = float(eps)
    delta = float(delta)
    scale = float(1.0 + gamma * delta)

    def kernel(m_ref, b_ref, o_ref):
        # m_ref : SMEM f32[1]   -> slope parameter m
        # b_ref : SMEM f32[1]   -> offset parameter b
        # o_ref : VMEM f32[1,1] -> scalar objective
        m = m_ref[0]
        b = b_ref[0]
        # Scalar core computes the two logits; splat into (1,1) vregs so the
        # sigmoid takes the EUP vector path.  No VMEM inputs, no XLU reduce.
        z0 = b              # m * 0 + b
        z1 = m * eps + b
        u0 = scale * jax.nn.sigmoid(jnp.full((1, 1), z0, dtype=jnp.float32))
        u1 = scale * jax.nn.sigmoid(jnp.full((1, 1), z1, dtype=jnp.float32))
        d0 = delta - u0
        d1 = (1.0 + delta) - u1
        o_ref[...] = d0 * d0 + d1 * d1

    return kernel


@functools.partial(jax.jit, static_argnames=("eps", "delta", "gamma"))
def tight_sigmoid_lower(m, b, *, eps=EPS, delta=DELTA, gamma=GAMMA):
    """m, b: f32[1] parameters (like nn.Parameter(torch.zeros(1))). Returns scalar f32."""
    # For f32[1] inputs these are trace-time no-ops (same dtype / same shape).
    m = jnp.reshape(jnp.asarray(m, dtype=jnp.float32), (1,))
    b = jnp.reshape(jnp.asarray(b, dtype=jnp.float32), (1,))

    out = pl.pallas_call(
        _make_kernel(eps, delta, gamma),
        out_shape=jax.ShapeDtypeStruct((1, 1), jnp.float32),
        in_specs=[pl.BlockSpec(memory_space=pltpu.SMEM),   # m
                  pl.BlockSpec(memory_space=pltpu.SMEM)],  # b
        out_specs=pl.BlockSpec((1, 1), lambda: (0, 0)),
        cost_estimate=pl.CostEstimate(flops=16, transcendentals=2,
                                      bytes_accessed=12),
    )(m, b)
    # Shape-only reshape (bitcast) instead of a post-call slice.
    return jnp.reshape(out, ())


def _reference(m, b, eps=EPS, delta=DELTA, gamma=GAMMA):
    def u(a):
        return (1.0 + gamma * delta) * jax.nn.sigmoid(m * a + b)

    return jnp.square(delta - u(0.0)) + jnp.square(1.0 + delta - u(eps))


if __name__ == "__main__":
    key = jax.random.PRNGKey(0)
    km, kb = jax.random.split(key)
    # Small deterministic parameters (nonzero, so the check is nontrivial).
    m = jax.random.normal(km, (1,), dtype=jnp.float32)
    b = jax.random.normal(kb, (1,), dtype=jnp.float32)

    # Default constants, and a different gamma (honored via closure constant).
    for gamma in (GAMMA, 3):
        obj = jax.block_until_ready(tight_sigmoid_lower(m, b, gamma=gamma))
        ref = _reference(m[0], b[0], gamma=gamma)
        assert jnp.allclose(obj, ref, atol=1e-6, rtol=1e-6), (gamma, obj, ref)

    # Module's actual init state: m = b = 0.
    z = jnp.zeros((1,), dtype=jnp.float32)
    obj0 = jax.block_until_ready(tight_sigmoid_lower(z, z))
    ref0 = _reference(0.0, 0.0)
    assert jnp.allclose(obj0, ref0, atol=1e-6, rtol=1e-6), (obj0, ref0)

    print("KERNEL_OK")
</pallas_src>

<mosaic_0001>
module attributes {stable_mosaic.version = 11 : i64} {
  func.func @kernel(%arg0: memref<1xf32, #tpu.memory_space<smem>>, %arg1: memref<1xf32, #tpu.memory_space<smem>>, %arg2: memref<1x1xf32, #tpu.memory_space<vmem>>) attributes {dimension_semantics = [], scalar_prefetch = 0 : i64, scratch_operands = 0 : i64, tpu.core_type = #tpu.core_type<tc>} {
    %c0 = arith.constant 0 : index
    %0 = memref.load %arg0[%c0] : memref<1xf32, #tpu.memory_space<smem>>
    %c0_0 = arith.constant 0 : index
    %1 = memref.load %arg1[%c0_0] : memref<1xf32, #tpu.memory_space<smem>>
    %cst = arith.constant 7.500000e-01 : f32
    %2 = arith.mulf %0, %cst : f32
    %3 = arith.addf %2, %1 : f32
    %4 = vector.broadcast %1 : f32 to vector<1x1xf32>
    %5 = arith.negf %4 : vector<1x1xf32>
    %6 = math.exp %5 : vector<1x1xf32>
    %cst_1 = arith.constant 1.000000e+00 : f32
    %7 = vector.broadcast %cst_1 : f32 to vector<1x1xf32>
    %8 = arith.addf %7, %6 : vector<1x1xf32>
    %9 = arith.divf %7, %8 : vector<1x1xf32>
    %cst_2 = arith.constant 1.245000e+00 : f32
    %10 = vector.broadcast %cst_2 : f32 to vector<1x1xf32>
    %11 = arith.mulf %10, %9 : vector<1x1xf32>
    %12 = vector.broadcast %3 : f32 to vector<1x1xf32>
    %13 = arith.negf %12 : vector<1x1xf32>
    %14 = math.exp %13 : vector<1x1xf32>
    %cst_3 = arith.constant 1.000000e+00 : f32
    %15 = vector.broadcast %cst_3 : f32 to vector<1x1xf32>
    %16 = arith.addf %15, %14 : vector<1x1xf32>
    %17 = arith.divf %15, %16 : vector<1x1xf32>
    %cst_4 = arith.constant 1.245000e+00 : f32
    %18 = vector.broadcast %cst_4 : f32 to vector<1x1xf32>
    %19 = arith.mulf %18, %17 : vector<1x1xf32>
    %cst_5 = arith.constant 3.500000e-02 : f32
    %20 = vector.broadcast %cst_5 : f32 to vector<1x1xf32>
    %21 = arith.subf %20, %11 : vector<1x1xf32>
    %cst_6 = arith.constant 1.035000e+00 : f32
    %22 = vector.broadcast %cst_6 : f32 to vector<1x1xf32>
    %23 = arith.subf %22, %19 : vector<1x1xf32>
    %24 = arith.mulf %21, %21 : vector<1x1xf32>
    %25 = arith.mulf %23, %23 : vector<1x1xf32>
    %26 = arith.addf %24, %25 : vector<1x1xf32>
    %c0_7 = arith.constant 0 : index
    %c0_8 = arith.constant 0 : index
    %27 = vector.load %arg2[%c0_7, %c0_8] : memref<1x1xf32, #tpu.memory_space<vmem>>, vector<1x1xf32>
    tpu.vector_store %arg2[%c0_7, %c0_8], %26 {strides = array<i32>} : memref<1x1xf32, #tpu.memory_space<vmem>>, vector<1x1xf32>,
    return
  }
}

</mosaic_0001>

<bundles_post_ra>
// kernel: tight_sigmoid_lower.1
= control target key start
LH: loop header
LB: loop body
LE: loop exit
PB: predicated region body
PF: predicated region fallthrough
CT: control target
= control target key end

     0   :  { %s127_s0 = inlined_call_operand.<no memory space> [shape: f32[1], index: 0, kind: input, shape index: {}]   ;;  %s128_s1 = inlined_call_operand.<no memory space> [shape: f32[1], index: 1, kind: input, shape index: {}]   ;;  %s129_s2 = inlined_call_operand.hbm [shape: f32[1,1], index: 2, kind: output, shape index: {}]  }
   0x1   :  { %s16_s11 = smul.f32 0.75, %s127_s0  ;;  %v18_v0 = vstv %s128_s1 }
   0x2   :  { %9 = vsyncpa [#allocation5], 0  ;;  %v55_v1 = vmul.f32 -1.442695, %v18_v0  ;;  %s90_s0 = smov [#allocation4]   ;;  %vm39_vm0 = vcmask 0  }
   0x3   :  { %s17_s16 = sadd.f32 %s16_s11, %s128_s1  ;;  %s47_s17 = sshll.u32 %s90_s0, 4  ;;  %s48_s17 = int_to_ptr.vmem [resolvable:$true] %s47_s17 }
   0x4   :  { %58 = vpow2.f32 %v55_v1  ;;  %s66_s1 = scalar_lea.vmem %s48_s17, 16  ;;  %s70_s18 = scalar_lea.vmem %s48_s17, 32 }
   0x5   :  { %v26_v2 = vstv %s17_s16  ;;  %p67_p0 = scmp.ne.s32.totalorder %s48_s17, %s66_s1  ;;  %p71_p1 = scmp.lt.s32.totalorder %s48_s17, %s48_s17 }
   0x6   :  { %v56_v3 = vmul.f32 -1.442695, %v26_v2  ;;  %p72_p2 = scmp.lt.s32.totalorder %s70_s18, %s66_s1 }
   0x8   :  { %60 = vpow2.f32 %v56_v3  ;;  %p73_p3 = por %p72_p2, %p71_p1 }
   0xa   :  { %p74_p4 = pnand %p73_p3, %p67_p0 }
   0xe   :  { %v59_v4 = vpop.eup %58 }
   0xf   :  { %v22_v5 = vadd.f32 1.0, %v59_v4 }
  0x11   :  { %62 = vrcp.f32 %v22_v5 }
  0x12   :  { %v61_v6 = vpop.eup %60 }
  0x13   :  { %v30_v7 = vadd.f32 1.0, %v61_v6 }
  0x15   :  { %64 = vrcp.f32 %v30_v7 }
  0x1b   :  { %v63_v8 = vpop.eup %62 }
  0x1c   :  { %v25_v9 = vmul.f32 1.245, %v63_v8 }
  0x1e   :  { %v34_v10 = vsub.f32 0.035, %v25_v9 }
  0x1f   :  { %v65_v11 = vpop.eup %64 }
  0x20   :  { %v33_v12 = vmul.f32 1.245, %v65_v11  ;;  %v36_v14 = vmul.f32 %v34_v10, %v34_v10 }
  0x22   :  { %v35_v13 = vsub.f32 1.035, %v33_v12 }
  0x24   :  { %v37_v15 = vmul.f32 %v35_v13, %v35_v13 }
  0x26   :  { %v38_v16 = vadd.f32 %v37_v15, %v36_v14 }
  0x28   :  { %40 = vst.msk [vmem:[#allocation4] sm:$0x1] %vm39_vm0, %v38_v16 }
  0x29   :  { %77 = shalt.err (!%p74_p4)
}
  0x2a   :  { %s78_s21 = scalar_lea.hbm %s129_s2, 16 }
  0x2b   :  { %p79_p5 = scmp.ne.s32.totalorder %s129_s2, %s78_s21  ;;  %p82_p6 = scmp.lt.u32.totalorder %s78_s21, %s129_s2 }
  0x2d   :  { %p84_p7 = pnand %p82_p6, %p79_p5 }
  0x2f   :  { %87 = shalt.err (!%p84_p7)
}
  0x30   :  { %50 = dma.vmem_to_hbm [thread:$0]  %s48_s17, 16, %s129_s2, [#allocation5]  }
  0x31   :  { %88 = dma.done.wait [#allocation5], 16  }
  0x32   :  { %89 = vsyncadd [#allocation5], 4294967280 }
  0x33   :  { %54 = vsyncpa [#allocation5], 1 }

</bundles_post_ra>
